<compile_context>
chip_gen: v7x
topology: tpu7x:2x2x1
jax: 0.10.0
libtpu: 0.0.40
codegen_flags: <defaults>
</compile_context>

<pallas_src>
import jax
import jax.numpy as jnp
from jax.experimental import pallas as pl
from jax.experimental.pallas import tpu as pltpu


def _mlp_kernel(x_ref, w1_ref, b1_ref, w2_ref, b2_ref, o_ref):
    # Standardization is pre-folded into w1/b1 by the wrapper.
    h = jnp.dot(x_ref[...], w1_ref[...], preferred_element_type=jnp.float32) + b1_ref[...]
    h = jnp.maximum(h, 0.0)
    o_ref[...] = (jnp.dot(h, w2_ref[...], preferred_element_type=jnp.float32)
                  + b2_ref[...]).astype(o_ref.dtype)


def _round_up(n, m):
    return ((n + m - 1) // m) * m


def rescale_and_net(x, mean, scale, w1, b1, w2, b2, *, row_tile=None):
    """net((x - mean) / scale).  x: (..., D); weights in (in, out) layout.

    Returns an array with the same leading dims as x and last dim w2.shape[1].
    """
    orig_shape = x.shape
    D = x.shape[-1]
    H = w1.shape[1]
    O = w2.shape[1]

    x2 = x.reshape(-1, D).astype(jnp.float32)      # flatten exactly like scale_samples
    R = x2.shape[0]

    # --- fold StandardScaler into layer 1 (O(D*H) once per call, vs O(R*D) per row) ---
    inv_scale = (1.0 / scale).astype(jnp.float32)                       # (D,)
    w1f = (inv_scale[:, None] * w1.astype(jnp.float32))                 # (D, H)
    b1f = (b1.astype(jnp.float32)
           - (mean.astype(jnp.float32) * inv_scale) @ w1.astype(jnp.float32))  # (H,)
    w2f = w2.astype(jnp.float32)
    b1_2 = b1f.reshape(1, H)
    b2_2 = b2.reshape(1, O).astype(jnp.float32)

    # --- row tiling: large tiles, multiple of 256 (=> also 128 and 8) ---
    if row_tile is None:
        row_tile = min(2048, _round_up(max(R, 1), 256))
    row_tile = max(256, _round_up(row_tile, 256))

    R_pad = _round_up(max(R, 1), row_tile)
    if R_pad != R:
        x2 = jnp.pad(x2, ((0, R_pad - R), (0, 0)))   # zero rows pass harmlessly through net

    grid = (R_pad // row_tile,)

    out2 = pl.pallas_call(
        _mlp_kernel,
        out_shape=jax.ShapeDtypeStruct((R_pad, O), jnp.float32),
        grid_spec=pltpu.PrefetchScalarGridSpec(
            num_scalar_prefetch=0,
            grid=grid,
            in_specs=[
                pl.BlockSpec((row_tile, D), lambda i: (i, 0)),   # x rows (streamed)
                pl.BlockSpec((D, H), lambda i: (0, 0)),          # W1' (resident, fetched once)
                pl.BlockSpec((1, H), lambda i: (0, 0)),          # b1'
                pl.BlockSpec((H, O), lambda i: (0, 0)),          # W2
                pl.BlockSpec((1, O), lambda i: (0, 0)),          # b2
            ],
            out_specs=pl.BlockSpec((row_tile, O), lambda i: (i, 0)),
        ),
        compiler_params=pltpu.CompilerParams(
            dimension_semantics=("parallel",),       # megacore sharding on v7x
            vmem_limit_bytes=32 * 1024 * 1024,       # plenty: ~1.5 MiB resident at tile=2048
        ),
    )(x2, w1f, b1_2, w2f, b2_2)

    if R_pad != R:
        out2 = out2[:R]
    return out2.reshape(orig_shape[:-1] + (O,))


def _reference(x, mean, scale, w1, b1, w2, b2):
    xs = (x - mean) / scale
    h = jnp.maximum(xs @ w1 + b1, 0.0)
    return h @ w2 + b2


if __name__ == "__main__":
    key = jax.random.PRNGKey(0)
    B, N, D, H, O = 2, 8, 32, 64, 8   # small demo shapes; R = B*N = 16 rows

    ks = jax.random.split(key, 8)
    x = jax.random.normal(ks[0], (B, N, D), dtype=jnp.float32)

    # Deterministic "scaler" parameters (StandardScaler-style: mean_, scale_)
    mean = jax.random.normal(ks[1], (D,), dtype=jnp.float32) * 0.5
    scale = jax.random.uniform(ks[2], (D,), dtype=jnp.float32, minval=0.5, maxval=2.0)

    # Deterministic net parameters: Linear(D,H) -> ReLU -> Linear(H,O), (in,out) layout
    w1 = jax.random.normal(ks[3], (D, H), dtype=jnp.float32) / jnp.sqrt(D)
    b1 = jax.random.normal(ks[4], (H,), dtype=jnp.float32) * 0.1
    w2 = jax.random.normal(ks[5], (H, O), dtype=jnp.float32) / jnp.sqrt(H)
    b2 = jax.random.normal(ks[6], (O,), dtype=jnp.float32) * 0.1

    # Small-shape check (R=16 -> padded to one 256-row tile)
    out = rescale_and_net(x, mean, scale, w1, b1, w2, b2)
    jax.block_until_ready(out)
    ref = _reference(x, mean, scale, w1, b1, w2, b2)
    assert out.shape == (B, N, O), out.shape
    assert jnp.allclose(out, ref, atol=1e-4, rtol=1e-4), "mismatch vs reference (small)"

    # Larger, non-tile-multiple row count to exercise the padded multi-tile grid path
    x_big = jax.random.normal(ks[7], (3, 700, D), dtype=jnp.float32)  # R = 2100 rows
    out_big = rescale_and_net(x_big, mean, scale, w1, b1, w2, b2)
    jax.block_until_ready(out_big)
    ref_big = _reference(x_big, mean, scale, w1, b1, w2, b2)
    assert out_big.shape == (3, 700, O), out_big.shape
    assert jnp.allclose(out_big, ref_big, atol=1e-4, rtol=1e-4), "mismatch vs reference (big)"

    print("KERNEL_OK")
</pallas_src>

<mosaic_0001>
module attributes {stable_mosaic.version = 11 : i64} {
  func.func @_mlp_kernel(%arg0: i32, %arg1: memref<256x32xf32, #tpu.memory_space<vmem>>, %arg2: memref<32x64xf32, #tpu.memory_space<vmem>>, %arg3: memref<1x64xf32, #tpu.memory_space<vmem>>, %arg4: memref<64x8xf32, #tpu.memory_space<vmem>>, %arg5: memref<1x8xf32, #tpu.memory_space<vmem>>, %arg6: memref<256x8xf32, #tpu.memory_space<vmem>>) attributes {dimension_semantics = [#tpu.dimension_semantics<parallel>], iteration_bounds = array<i64: 1>, scalar_prefetch = 0 : i64, scratch_operands = 0 : i64, tpu.core_type = #tpu.core_type<tc>, window_params = [{transform_indices = @transform_0, window_bounds = array<i64: 256, 32>}, {pipeline_mode = #tpu.pipeline_mode<synchronous>, transform_indices = @transform_1, window_bounds = array<i64: 32, 64>}, {pipeline_mode = #tpu.pipeline_mode<synchronous>, transform_indices = @transform_2, window_bounds = array<i64: 1, 64>}, {pipeline_mode = #tpu.pipeline_mode<synchronous>, transform_indices = @transform_3, window_bounds = array<i64: 64, 8>}, {pipeline_mode = #tpu.pipeline_mode<synchronous>, transform_indices = @transform_4, window_bounds = array<i64: 1, 8>}, {transform_indices = @transform_5, window_bounds = array<i64: 256, 8>}]} {
    %c0 = arith.constant 0 : index
    %c0_0 = arith.constant 0 : index
    %0 = vector.load %arg1[%c0, %c0_0] : memref<256x32xf32, #tpu.memory_space<vmem>>, vector<256x32xf32>
    %c0_1 = arith.constant 0 : index
    %c0_2 = arith.constant 0 : index
    %1 = vector.load %arg2[%c0_1, %c0_2] : memref<32x64xf32, #tpu.memory_space<vmem>>, vector<32x64xf32>
    %cst = arith.constant dense<0.000000e+00> : vector<256x64xf32>
    %2 = tpu.matmul %0, %1, %cst {dimension_numbers = #tpu.dot_dimension_numbers<[1], [0], [0], [1], [0, 0, 1, 1], [], []>} : vector<256x32xf32>, vector<32x64xf32>, vector<256x64xf32> -> vector<256x64xf32>
    %c0_3 = arith.constant 0 : index
    %c0_4 = arith.constant 0 : index
    %3 = vector.load %arg3[%c0_3, %c0_4] : memref<1x64xf32, #tpu.memory_space<vmem>>, vector<1x64xf32>
    %4 = vector.broadcast %3 : vector<1x64xf32> to vector<256x64xf32>
    %5 = arith.addf %2, %4 : vector<256x64xf32>
    %cst_5 = arith.constant 0.000000e+00 : f32
    %6 = vector.broadcast %cst_5 : f32 to vector<256x64xf32>
    %7 = arith.maximumf %5, %6 : vector<256x64xf32>
    %c0_6 = arith.constant 0 : index
    %c0_7 = arith.constant 0 : index
    %8 = vector.load %arg4[%c0_6, %c0_7] : memref<64x8xf32, #tpu.memory_space<vmem>>, vector<64x8xf32>
    %cst_8 = arith.constant dense<0.000000e+00> : vector<256x8xf32>
    %9 = tpu.matmul %7, %8, %cst_8 {dimension_numbers = #tpu.dot_dimension_numbers<[1], [0], [0], [1], [0, 0, 1, 1], [], []>} : vector<256x64xf32>, vector<64x8xf32>, vector<256x8xf32> -> vector<256x8xf32>
    %c0_9 = arith.constant 0 : index
    %c0_10 = arith.constant 0 : index
    %10 = vector.load %arg5[%c0_9, %c0_10] : memref<1x8xf32, #tpu.memory_space<vmem>>, vector<1x8xf32>
    %11 = vector.broadcast %10 : vector<1x8xf32> to vector<256x8xf32>
    %12 = arith.addf %9, %11 : vector<256x8xf32>
    %c0_11 = arith.constant 0 : index
    %c0_12 = arith.constant 0 : index
    %13 = vector.load %arg6[%c0_11, %c0_12] : memref<256x8xf32, #tpu.memory_space<vmem>>, vector<256x8xf32>
    tpu.vector_store %arg6[%c0_11, %c0_12], %12 {strides = array<i32>} : memref<256x8xf32, #tpu.memory_space<vmem>>, vector<256x8xf32>,
    return
  }
  func.func @transform_0(%arg0: i32) -> (i32, i32) {
    %c0_i32 = arith.constant 0 : i32
    %c0_i32_0 = arith.constant 0 : i32
    return %arg0, %c0_i32 : i32, i32
  }
  func.func @transform_1(%arg0: i32) -> (i32, i32) {
    %c0_i32 = arith.constant 0 : i32
    %c0_i32_0 = arith.constant 0 : i32
    %c0_i32_1 = arith.constant 0 : i32
    return %c0_i32, %c0_i32_0 : i32, i32
  }
  func.func @transform_2(%arg0: i32) -> (i32, i32) {
    %c0_i32 = arith.constant 0 : i32
    %c0_i32_0 = arith.constant 0 : i32
    %c0_i32_1 = arith.constant 0 : i32
    return %c0_i32, %c0_i32_0 : i32, i32
  }
  func.func @transform_3(%arg0: i32) -> (i32, i32) {
    %c0_i32 = arith.constant 0 : i32
    %c0_i32_0 = arith.constant 0 : i32
    %c0_i32_1 = arith.constant 0 : i32
    return %c0_i32, %c0_i32_0 : i32, i32
  }
  func.func @transform_4(%arg0: i32) -> (i32, i32) {
    %c0_i32 = arith.constant 0 : i32
    %c0_i32_0 = arith.constant 0 : i32
    %c0_i32_1 = arith.constant 0 : i32
    return %c0_i32, %c0_i32_0 : i32, i32
  }
  func.func @transform_5(%arg0: i32) -> (i32, i32) {
    %c0_i32 = arith.constant 0 : i32
    %c0_i32_0 = arith.constant 0 : i32
    return %arg0, %c0_i32 : i32, i32
  }
}

</mosaic_0001>

<bundles_post_ra>
// kernel: tpu_custom_call.1
= control target key start
LH: loop header
LB: loop body
LE: loop exit
PB: predicated region body
PF: predicated region fallthrough
CT: control target
= control target key end

     0   :  { %vm63_vm0 = vcmask 261120   ;;  %vm432_vm1 = vcmask 523264   ;;  %vm754_vm2 = vcmask 64512   ;;  %s1513_s1 = inlined_call_operand.vmem [shape: f32[32,64], index: 1, kind: input, shape index: {}]   ;;  %s1514_s0 = inlined_call_operand.vmem [shape: f32[256,32], index: 0, kind: input, shape index: {}]   ;;  %s1515_s3 = inlined_call_operand.vmem [shape: f32[64,8], index: 3, kind: input, shape index: {}]   ;;  %s1516_s2 = inlined_call_operand.vmem [shape: f32[1,64], index: 2, kind: input, shape index: {}]   ;;  %s1517_s4 = inlined_call_operand.vmem [shape: f32[1,8], index: 4, kind: input, shape index: {}]   ;;  %s1518_s5 = inlined_call_operand.vmem [shape: f32[256,8], index: 5, kind: output, shape index: {}]  }
   0x1   :  { %v52_v0 = vld [vmem:[%s1513_s1] sm:$0xff]  ;;  %v53_v1 = vld [vmem:[%s1513_s1 + $0x8] sm:$0xff]  ;;  %v54_v2 = vld [vmem:[%s1513_s1 + $0x10] sm:$0xff] }
   0x2   :  { %v1053_v3 = vpack.c.bf16 %v53_v1, %v52_v0  ;;  %v55_v4 = vld [vmem:[%s1513_s1 + $0x18] sm:$0xff]  ;;  %v20_v5 = vld [vmem:[%s1514_s0] sm:$0xff]  ;;  %v21_v7 = vld [vmem:[%s1514_s0 + $0x8] sm:$0xff] }
   0x3   :  { %v1057_v6 = vpack.c.bf16 %v55_v4, %v54_v2  ;;  %941 = vmatprep.mubr.msk.f32.mxu0 %vm63_vm0, %v20_v5  ;;  %v22_v8 = vld [vmem:[%s1514_s0 + $0x10] sm:$0xff]  ;;  %v23_v9 = vld [vmem:[%s1514_s0 + $0x18] sm:$0xff]  ;;  %v417_v10 = vld [vmem:[%s1515_s3] sm:$0xff] }
   0x4   :  { %1054 = vmatprep.subr.bf16.mxu0 %v1053_v3  ;;  %v418_v11 = vld [vmem:[%s1515_s3 + $0x8] sm:$0xff]  ;;  %v419_v12 = vld [vmem:[%s1515_s3 + $0x10] sm:$0xff]  ;;  %v24_v13 = vld [vmem:[%s1514_s0 + $0x20] sm:$0xff] }
   0x5   :  { %1056 = vmatpush3.bf16.msra.mxu0 %v1053_v3  ;;  %v1061_v14 = vpack.c.bf16 %v418_v11, %v417_v10  ;;  %v420_v15 = vld [vmem:[%s1515_s3 + $0x18] sm:$0xff]  ;;  %v421_v17 = vld [vmem:[%s1515_s3 + $0x20] sm:$0xff]  ;;  %v422_v18 = vld [vmem:[%s1515_s3 + $0x28] sm:$0xff] }
   0x6   :  { %1058 = vmatprep.subr.bf16.mxu0 %v1057_v6  ;;  %v1065_v16 = vpack.c.bf16 %v420_v15, %v419_v12  ;;  %v25_v19 = vld [vmem:[%s1514_s0 + $0x28] sm:$0xff]  ;;  %v26_v20 = vld [vmem:[%s1514_s0 + $0x30] sm:$0xff]  ;;  %v1069_v21 = vpack.c.bf16 %v422_v18, %v421_v17  ;;  %v27_v22 = vld [vmem:[%s1514_s0 + $0x38] sm:$0xff] }
   0x7   :  { %1077 = vmatprep.subr.bf16.mxu1 %v1061_v14  ;;  %v28_v23 = vld [vmem:[%s1514_s0 + $0x40] sm:$0xff]  ;;  %v29_v24 = vld [vmem:[%s1514_s0 + $0x48] sm:$0xff]  ;;  %v30_v25 = vld [vmem:[%s1514_s0 + $0x50] sm:$0xff] }
   0x8   :  { %1081 = vmatpush3.bf16.msra.mxu1 %v1061_v14  ;;  %v31_v26 = vld [vmem:[%s1514_s0 + $0x58] sm:$0xff]  ;;  %v32_v27 = vld [vmem:[%s1514_s0 + $0x60] sm:$0xff]  ;;  %v33_v28 = vld [vmem:[%s1514_s0 + $0x68] sm:$0xff] }
   0x9   :  { %1060 = vmatpush3.bf16.msra.mxu0 %v1057_v6  ;;  %1078 = vmatprep.subr.bf16.mxu1 %v1065_v16  ;;  %v34_v29 = vld [vmem:[%s1514_s0 + $0x70] sm:$0xff]  ;;  %v35_v30 = vld [vmem:[%s1514_s0 + $0x78] sm:$0xff]  ;;  %v36_v31 = vld [vmem:[%s1514_s0 + $0x80] sm:$0xff] }
   0xa   :  { %1062 = vmatprep.subr.bf16.mxu0 %v1061_v14  ;;  %v37_v32 = vld [vmem:[%s1514_s0 + $0x88] sm:$0xff]  ;;  %v38_v33 = vld [vmem:[%s1514_s0 + $0x90] sm:$0xff]  ;;  %v39_v34 = vld [vmem:[%s1514_s0 + $0x98] sm:$0xff] }
   0xb   :  { %v40_v35 = vld [vmem:[%s1514_s0 + $0xa0] sm:$0xff]  ;;  %v41_v36 = vld [vmem:[%s1514_s0 + $0xa8] sm:$0xff]  ;;  %v42_v37 = vld [vmem:[%s1514_s0 + $0xb0] sm:$0xff] }
   0xc   :  { %942 = vmatmul.mubr.msk.f32.vlgmr.msra.gmra.mrb[0].mxu0 %vm63_vm0, %v21_v7  ;;  %1082 = vmatpush3.bf16.msra.mxu1 %v1065_v16  ;;  %v43_v38 = vld [vmem:[%s1514_s0 + $0xb8] sm:$0xff]  ;;  %v44_v39 = vld [vmem:[%s1514_s0 + $0xc0] sm:$0xff]  ;;  %v45_v40 = vld [vmem:[%s1514_s0 + $0xc8] sm:$0xff] }
   0xd   :  { %944 = vmatprep.mubr.msk.f32.mxu0 %vm63_vm0, %v22_v8  ;;  %1064 = vmatpush3.bf16.msra.mxu0 %v1061_v14  ;;  %v46_v41 = vld [vmem:[%s1514_s0 + $0xd0] sm:$0xff]  ;;  %v47_v42 = vld [vmem:[%s1514_s0 + $0xd8] sm:$0xff]  ;;  %v48_v43 = vld [vmem:[%s1514_s0 + $0xe0] sm:$0xff] }
   0xe   :  { %1066 = vmatprep.subr.bf16.mxu0 %v1065_v16  ;;  %1079 = vmatprep.subr.bf16.mxu1 %v1069_v21  ;;  %v49_v44 = vld [vmem:[%s1514_s0 + $0xe8] sm:$0xff]  ;;  %v50_v45 = vld [vmem:[%s1514_s0 + $0xf0] sm:$0xff]  ;;  %v51_v46 = vld [vmem:[%s1514_s0 + $0xf8] sm:$0xff] }
   0xf   :  { %v423_v47 = vld [vmem:[%s1515_s3 + $0x30] sm:$0xff]  ;;  %v424_v48 = vld [vmem:[%s1515_s3 + $0x38] sm:$0xff]  ;;  %v1282_v50 = vld [vmem:[%s1516_s2] ss:$0 sm:$0xff] }
  0x10   :  { %945 = vmatmul.mubr.msk.f32.gmra.mrb[2].mxu0 %vm63_vm0, %v23_v9  ;;  %1083 = vmatpush3.bf16.msra.mxu1 %v1069_v21  ;;  %v1073_v49 = vpack.c.bf16 %v424_v48, %v423_v47 }
  0x11   :  { %947 = vmatprep.mubr.msk.f32.mxu0 %vm63_vm0, %v24_v13  ;;  %1068 = vmatpush3.bf16.msra.mxu0 %v1065_v16 }
  0x12   :  { %1070 = vmatprep.subr.bf16.mxu0 %v1069_v21  ;;  %1080 = vmatprep.subr.bf16.mxu1 %v1073_v49 }
  0x14   :  { %948 = vmatmul.mubr.msk.f32.gmra.mrb[4].mxu0 %vm63_vm0, %v25_v19  ;;  %1084 = vmatpush3.bf16.msra.mxu1 %v1073_v49 }
  0x15   :  { %950 = vmatprep.mubr.msk.f32.mxu0 %vm63_vm0, %v26_v20  ;;  %1072 = vmatpush3.bf16.msra.mxu0 %v1069_v21 }
  0x16   :  { %1074 = vmatprep.subr.bf16.mxu0 %v1073_v49 }
  0x18   :  { %951 = vmatmul.mubr.msk.f32.gmra.mrb[6].mxu0 %vm63_vm0, %v27_v22 }
  0x19   :  { %953 = vmatprep.mubr.msk.f32.mxu0 %vm63_vm0, %v28_v23  ;;  %1076 = vmatpush3.bf16.msra.mxu0 %v1073_v49 }
  0x1c   :  { %954 = vmatmul.mubr.msk.f32.gmra.mrb[8].mxu0 %vm63_vm0, %v29_v24 }
  0x1d   :  { %956 = vmatprep.mubr.msk.f32.mxu0 %vm63_vm0, %v30_v25 }
  0x20   :  { %957 = vmatmul.mubr.msk.f32.gmra.mrb[10].mxu0 %vm63_vm0, %v31_v26 }
  0x21   :  { %959 = vmatprep.mubr.msk.f32.mxu0 %vm63_vm0, %v32_v27 }
  0x24   :  { %960 = vmatmul.mubr.msk.f32.gmra.mrb[12].mxu0 %vm63_vm0, %v33_v28 }
  0x25   :  { %962 = vmatprep.mubr.msk.f32.mxu0 %vm63_vm0, %v34_v29 }
  0x28   :  { %963 = vmatmul.mubr.msk.f32.gmra.mrb[14].mxu0 %vm63_vm0, %v35_v30 }
  0x29   :  { %965 = vmatprep.mubr.msk.f32.mxu0 %vm63_vm0, %v36_v31 }
  0x2c   :  { %966 = vmatmul.mubr.msk.f32.gmra.mrb[16].mxu0 %vm63_vm0, %v37_v32 }
  0x2d   :  { %968 = vmatprep.mubr.msk.f32.mxu0 %vm63_vm0, %v38_v33 }
  0x30   :  { %969 = vmatmul.mubr.msk.f32.gmra.mrb[18].mxu0 %vm63_vm0, %v39_v34 }
  0x31   :  { %971 = vmatprep.mubr.msk.f32.mxu0 %vm63_vm0, %v40_v35 }
  0x34   :  { %972 = vmatmul.mubr.msk.f32.gmra.mrb[20].mxu0 %vm63_vm0, %v41_v36 }
  0x35   :  { %974 = vmatprep.mubr.msk.f32.mxu0 %vm63_vm0, %v42_v37 }
  0x38   :  { %975 = vmatmul.mubr.msk.f32.gmra.mrb[22].mxu0 %vm63_vm0, %v43_v38 }
  0x39   :  { %977 = vmatprep.mubr.msk.f32.mxu0 %vm63_vm0, %v44_v39 }
  0x3c   :  { %978 = vmatmul.mubr.msk.f32.gmra.mrb[24].mxu0 %vm63_vm0, %v45_v40 }
  0x3d   :  { %980 = vmatprep.mubr.msk.f32.mxu0 %vm63_vm0, %v46_v41 }
  0x40   :  { %981 = vmatmul.mubr.msk.f32.gmra.mrb[26].mxu0 %vm63_vm0, %v47_v42 }
  0x41   :  { %983 = vmatprep.mubr.msk.f32.mxu0 %vm63_vm0, %v48_v43 }
  0x44   :  { %984 = vmatmul.mubr.msk.f32.gmra.mrb[28].mxu0 %vm63_vm0, %v49_v44 }
  0x45   :  { %986 = vmatprep.mubr.msk.f32.mxu0 %vm63_vm0, %v50_v45 }
  0x48   :  { %987 = vmatmul.mubr.msk.f32.gmra.mrb[30].mxu0 %vm63_vm0, %v51_v46 }
  0xdf   :  { %v943_v51 = vpop.f32.mrb[0].mxu0 }
  0xe0   :  { %v232_v52 = vadd.f32 %v943_v51, %v1282_v50  ;;  %v226_v53 = vpop.f32.mrb[1].mxu0 }
  0xe1   :  { %v227_v54 = vadd.f32 %v1282_v50, %v226_v53 }
  0xe2   :  { %v386_v57 = vmax.f32 %v232_v52, 0.0 }
  0xe3   :  { %v385_v55 = vmax.f32 %v227_v54, 0.0  ;;  %v946_v56 = vpop.f32.mrb[2].mxu0 }
  0xe4   :  { %v242_v58 = vadd.f32 %v946_v56, %v1282_v50  ;;  %v236_v59 = vpop.f32.mrb[3].mxu0 }
  0xe5   :  { %v237_v60 = vadd.f32 %v1282_v50, %v236_v59  ;;  %1005 = vmatprep.mubr.msk.f32.mxu0 %vm432_vm1, %v385_v55 }
  0xe6   :  { %1006 = vmatmul.mubr.msk.f32.vlgmr.msra.gmra.mrb[32].mxu0 %vm432_vm1, %v386_v57  ;;  %v388_v63 = vmax.f32 %v242_v58, 0.0 }
  0xe7   :  { %v387_v61 = vmax.f32 %v237_v60, 0.0  ;;  %v949_v62 = vpop.f32.mrb[4].mxu0 }
  0xe8   :  { %v252_v0 = vadd.f32 %v949_v62, %v1282_v50  ;;  %v246_v1 = vpop.f32.mrb[5].mxu0 }
  0xe9   :  { %v247_v2 = vadd.f32 %v1282_v50, %v246_v1  ;;  %1008 = vmatprep.mubr.msk.f32.mxu1 %vm432_vm1, %v387_v61 }
  0xea   :  { %1009 = vmatmul.mubr.msk.f32.vlgmr.msra.gmra.mrb[0].mxu1 %vm432_vm1, %v388_v63  ;;  %v390_v5 = vmax.f32 %v252_v0, 0.0 }
  0xeb   :  { %v389_v3 = vmax.f32 %v247_v2, 0.0  ;;  %v952_v4 = vpop.f32.mrb[6].mxu0 }
  0xec   :  { %v262_v6 = vadd.f32 %v952_v4, %v1282_v50  ;;  %v256_v7 = vpop.f32.mrb[7].mxu0 }
  0xed   :  { %v257_v8 = vadd.f32 %v1282_v50, %v256_v7  ;;  %1011 = vmatprep.mubr.msk.f32.mxu1 %vm432_vm1, %v389_v3 }
  0xee   :  { %1012 = vmatmul.mubr.msk.f32.gmra.mrb[2].mxu1 %vm432_vm1, %v390_v5  ;;  %v392_v11 = vmax.f32 %v262_v6, 0.0 }
  0xef   :  { %v391_v9 = vmax.f32 %v257_v8, 0.0  ;;  %v955_v10 = vpop.f32.mrb[8].mxu0 }
  0xf0   :  { %v272_v12 = vadd.f32 %v955_v10, %v1282_v50  ;;  %v266_v13 = vpop.f32.mrb[9].mxu0 }
  0xf1   :  { %v267_v14 = vadd.f32 %v1282_v50, %v266_v13  ;;  %1014 = vmatprep.mubr.msk.f32.mxu1 %vm432_vm1, %v391_v9 }
  0xf2   :  { %1015 = vmatmul.mubr.msk.f32.gmra.mrb[4].mxu1 %vm432_vm1, %v392_v11  ;;  %v394_v17 = vmax.f32 %v272_v12, 0.0 }
  0xf3   :  { %v393_v15 = vmax.f32 %v267_v14, 0.0  ;;  %v958_v16 = vpop.f32.mrb[10].mxu0 }
  0xf4   :  { %v282_v18 = vadd.f32 %v958_v16, %v1282_v50  ;;  %v276_v19 = vpop.f32.mrb[11].mxu0 }
  0xf5   :  { %v277_v20 = vadd.f32 %v1282_v50, %v276_v19  ;;  %1017 = vmatprep.mubr.msk.f32.mxu1 %vm432_vm1, %v393_v15 }
  0xf6   :  { %1018 = vmatmul.mubr.msk.f32.gmra.mrb[6].mxu1 %vm432_vm1, %v394_v17  ;;  %v396_v23 = vmax.f32 %v282_v18, 0.0 }
  0xf7   :  { %v395_v21 = vmax.f32 %v277_v20, 0.0  ;;  %v961_v22 = vpop.f32.mrb[12].mxu0  ;;  %v1351_v20 = vld [vmem:[%s1517_s4] ss:$0 sm:$0xff] }
  0xf8   :  { %v292_v24 = vadd.f32 %v961_v22, %v1282_v50  ;;  %v286_v25 = vpop.f32.mrb[13].mxu0 }
  0xf9   :  { %v287_v26 = vadd.f32 %v1282_v50, %v286_v25  ;;  %1020 = vmatprep.mubr.msk.f32.mxu1 %vm432_vm1, %v395_v21 }
  0xfa   :  { %1021 = vmatmul.mubr.msk.f32.gmra.mrb[8].mxu1 %vm432_vm1, %v396_v23  ;;  %v398_v29 = vmax.f32 %v292_v24, 0.0 }
  0xfb   :  { %v397_v27 = vmax.f32 %v287_v26, 0.0  ;;  %v964_v28 = vpop.f32.mrb[14].mxu0 }
  0xfc   :  { %v302_v30 = vadd.f32 %v964_v28, %v1282_v50  ;;  %v296_v31 = vpop.f32.mrb[15].mxu0 }
  0xfd   :  { %v297_v32 = vadd.f32 %v1282_v50, %v296_v31  ;;  %1023 = vmatprep.mubr.msk.f32.mxu1 %vm432_vm1, %v397_v27 }
  0xfe   :  { %1024 = vmatmul.mubr.msk.f32.gmra.mrb[10].mxu1 %vm432_vm1, %v398_v29  ;;  %v400_v35 = vmax.f32 %v302_v30, 0.0 }
  0xff   :  { %v399_v33 = vmax.f32 %v297_v32, 0.0  ;;  %v967_v34 = vpop.f32.mrb[16].mxu0 }
 0x100   :  { %v312_v36 = vadd.f32 %v967_v34, %v1282_v50  ;;  %v306_v37 = vpop.f32.mrb[17].mxu0 }
 0x101   :  { %v307_v38 = vadd.f32 %v1282_v50, %v306_v37  ;;  %1026 = vmatprep.mubr.msk.f32.mxu1 %vm432_vm1, %v399_v33 }
 0x102   :  { %1027 = vmatmul.mubr.msk.f32.gmra.mrb[12].mxu1 %vm432_vm1, %v400_v35  ;;  %v402_v41 = vmax.f32 %v312_v36, 0.0 }
 0x103   :  { %v401_v39 = vmax.f32 %v307_v38, 0.0  ;;  %v970_v40 = vpop.f32.mrb[18].mxu0 }
 0x104   :  { %v322_v42 = vadd.f32 %v970_v40, %v1282_v50  ;;  %v316_v43 = vpop.f32.mrb[19].mxu0 }
 0x105   :  { %v317_v44 = vadd.f32 %v1282_v50, %v316_v43  ;;  %1029 = vmatprep.mubr.msk.f32.mxu1 %vm432_vm1, %v401_v39 }
 0x106   :  { %1030 = vmatmul.mubr.msk.f32.gmra.mrb[14].mxu1 %vm432_vm1, %v402_v41  ;;  %v404_v47 = vmax.f32 %v322_v42, 0.0 }
 0x107   :  { %v403_v45 = vmax.f32 %v317_v44, 0.0  ;;  %v973_v46 = vpop.f32.mrb[20].mxu0 }
 0x108   :  { %v332_v48 = vadd.f32 %v973_v46, %v1282_v50  ;;  %v326_v49 = vpop.f32.mrb[21].mxu0 }
 0x109   :  { %v327_v51 = vadd.f32 %v1282_v50, %v326_v49  ;;  %1032 = vmatprep.mubr.msk.f32.mxu1 %vm432_vm1, %v403_v45 }
 0x10a   :  { %1033 = vmatmul.mubr.msk.f32.gmra.mrb[16].mxu1 %vm432_vm1, %v404_v47  ;;  %v406_v54 = vmax.f32 %v332_v48, 0.0 }
 0x10b   :  { %v405_v52 = vmax.f32 %v327_v51, 0.0  ;;  %v976_v53 = vpop.f32.mrb[22].mxu0 }
 0x10c   :  { %v342_v55 = vadd.f32 %v976_v53, %v1282_v50  ;;  %v336_v56 = vpop.f32.mrb[23].mxu0 }
 0x10d   :  { %v337_v57 = vadd.f32 %v1282_v50, %v336_v56  ;;  %1035 = vmatprep.mubr.msk.f32.mxu1 %vm432_vm1, %v405_v52 }
 0x10e   :  { %1036 = vmatmul.mubr.msk.f32.gmra.mrb[18].mxu1 %vm432_vm1, %v406_v54  ;;  %v408_v60 = vmax.f32 %v342_v55, 0.0 }
 0x10f   :  { %v407_v58 = vmax.f32 %v337_v57, 0.0  ;;  %v979_v59 = vpop.f32.mrb[24].mxu0 }
 0x110   :  { %v352_v61 = vadd.f32 %v979_v59, %v1282_v50  ;;  %v346_v62 = vpop.f32.mrb[25].mxu0 }
 0x111   :  { %v347_v63 = vadd.f32 %v1282_v50, %v346_v62  ;;  %1038 = vmatprep.mubr.msk.f32.mxu1 %vm432_vm1, %v407_v58 }
 0x112   :  { %1039 = vmatmul.mubr.msk.f32.gmra.mrb[20].mxu1 %vm432_vm1, %v408_v60  ;;  %v410_v2 = vmax.f32 %v352_v61, 0.0 }
 0x113   :  { %v409_v0 = vmax.f32 %v347_v63, 0.0  ;;  %v982_v1 = vpop.f32.mrb[26].mxu0 }
 0x114   :  { %v362_v3 = vadd.f32 %v982_v1, %v1282_v50  ;;  %v356_v4 = vpop.f32.mrb[27].mxu0 }
 0x115   :  { %v357_v5 = vadd.f32 %v1282_v50, %v356_v4  ;;  %1041 = vmatprep.mubr.msk.f32.mxu1 %vm432_vm1, %v409_v0 }
 0x116   :  { %1042 = vmatmul.mubr.msk.f32.gmra.mrb[22].mxu1 %vm432_vm1, %v410_v2  ;;  %v412_v8 = vmax.f32 %v362_v3, 0.0 }
 0x117   :  { %v411_v6 = vmax.f32 %v357_v5, 0.0  ;;  %v985_v7 = vpop.f32.mrb[28].mxu0 }
 0x118   :  { %v372_v9 = vadd.f32 %v985_v7, %v1282_v50  ;;  %v366_v10 = vpop.f32.mrb[29].mxu0 }
 0x119   :  { %v367_v11 = vadd.f32 %v1282_v50, %v366_v10  ;;  %1044 = vmatprep.mubr.msk.f32.mxu1 %vm432_vm1, %v411_v6 }
 0x11a   :  { %1045 = vmatmul.mubr.msk.f32.gmra.mrb[24].mxu1 %vm432_vm1, %v412_v8  ;;  %v414_v14 = vmax.f32 %v372_v9, 0.0 }
 0x11b   :  { %v413_v12 = vmax.f32 %v367_v11, 0.0  ;;  %v988_v13 = vpop.f32.mrb[30].mxu0 }
 0x11c   :  { %v382_v15 = vadd.f32 %v988_v13, %v1282_v50  ;;  %v376_v16 = vpop.f32.mrb[31].mxu0 }
 0x11d   :  { %v377_v17 = vadd.f32 %v1282_v50, %v376_v16  ;;  %1047 = vmatprep.mubr.msk.f32.mxu1 %vm432_vm1, %v413_v12 }
 0x11e   :  { %1048 = vmatmul.mubr.msk.f32.gmra.mrb[26].mxu1 %vm432_vm1, %v414_v14  ;;  %v416_v19 = vmax.f32 %v382_v15, 0.0 }
 0x11f   :  { %v415_v18 = vmax.f32 %v377_v17, 0.0 }
 0x121   :  { %1050 = vmatprep.mubr.msk.f32.mxu1 %vm432_vm1, %v415_v18 }
 0x122   :  { %1051 = vmatmul.mubr.msk.f32.gmra.mrb[28].mxu1 %vm432_vm1, %v416_v19 }
 0x1b9   :  { %v1007_v21 = vpop.f32.mrb[32].mxu0 }
 0x1ba   :  { %v601_v22 = vadd.f32 %v1007_v21, %v1351_v20  ;;  %v595_v50 = vpop.f32.mrb[33].mxu0 }
 0x1bb   :  { %v596_v23 = vadd.f32 %v1351_v20, %v595_v50 }
 0x1bc   :  { %756 = vst.msk [vmem:[%s1518_s5 + $0x8] sm:$0xff] %vm754_vm2, %v601_v22 }
 0x1bd   :  { %755 = vst.msk [vmem:[%s1518_s5] sm:$0xff] %vm754_vm2, %v596_v23  ;;  %v1010_v24 = vpop.f32.mrb[0].mxu1 }
 0x1be   :  { %v611_v25 = vadd.f32 %v1010_v24, %v1351_v20  ;;  %v605_v26 = vpop.f32.mrb[1].mxu1 }
 0x1bf   :  { %v606_v27 = vadd.f32 %v1351_v20, %v605_v26 }
 0x1c0   :  { %758 = vst.msk [vmem:[%s1518_s5 + $0x18] sm:$0xff] %vm754_vm2, %v611_v25 }
 0x1c1   :  { %757 = vst.msk [vmem:[%s1518_s5 + $0x10] sm:$0xff] %vm754_vm2, %v606_v27  ;;  %v1013_v28 = vpop.f32.mrb[2].mxu1 }
 0x1c2   :  { %v621_v29 = vadd.f32 %v1013_v28, %v1351_v20  ;;  %v615_v30 = vpop.f32.mrb[3].mxu1 }
 0x1c3   :  { %v616_v31 = vadd.f32 %v1351_v20, %v615_v30 }
 0x1c4   :  { %760 = vst.msk [vmem:[%s1518_s5 + $0x28] sm:$0xff] %vm754_vm2, %v621_v29 }
 0x1c5   :  { %759 = vst.msk [vmem:[%s1518_s5 + $0x20] sm:$0xff] %vm754_vm2, %v616_v31  ;;  %v1016_v32 = vpop.f32.mrb[4].mxu1 }
 0x1c6   :  { %v631_v33 = vadd.f32 %v1016_v32, %v1351_v20  ;;  %v625_v34 = vpop.f32.mrb[5].mxu1 }
 0x1c7   :  { %v626_v35 = vadd.f32 %v1351_v20, %v625_v34 }
 0x1c8   :  { %762 = vst.msk [vmem:[%s1518_s5 + $0x38] sm:$0xff] %vm754_vm2, %v631_v33 }
 0x1c9   :  { %761 = vst.msk [vmem:[%s1518_s5 + $0x30] sm:$0xff] %vm754_vm2, %v626_v35  ;;  %v1019_v36 = vpop.f32.mrb[6].mxu1 }
 0x1ca   :  { %v641_v37 = vadd.f32 %v1019_v36, %v1351_v20  ;;  %v635_v38 = vpop.f32.mrb[7].mxu1 }
 0x1cb   :  { %v636_v39 = vadd.f32 %v1351_v20, %v635_v38 }
 0x1cc   :  { %764 = vst.msk [vmem:[%s1518_s5 + $0x48] sm:$0xff] %vm754_vm2, %v641_v37 }
 0x1cd   :  { %763 = vst.msk [vmem:[%s1518_s5 + $0x40] sm:$0xff] %vm754_vm2, %v636_v39  ;;  %v1022_v40 = vpop.f32.mrb[8].mxu1 }
 0x1ce   :  { %v651_v41 = vadd.f32 %v1022_v40, %v1351_v20  ;;  %v645_v42 = vpop.f32.mrb[9].mxu1 }
 0x1cf   :  { %v646_v43 = vadd.f32 %v1351_v20, %v645_v42 }
 0x1d0   :  { %766 = vst.msk [vmem:[%s1518_s5 + $0x58] sm:$0xff] %vm754_vm2, %v651_v41 }
 0x1d1   :  { %765 = vst.msk [vmem:[%s1518_s5 + $0x50] sm:$0xff] %vm754_vm2, %v646_v43  ;;  %v1025_v44 = vpop.f32.mrb[10].mxu1 }
 0x1d2   :  { %v661_v45 = vadd.f32 %v1025_v44, %v1351_v20  ;;  %v655_v46 = vpop.f32.mrb[11].mxu1 }
 0x1d3   :  { %v656_v47 = vadd.f32 %v1351_v20, %v655_v46 }
 0x1d4   :  { %768 = vst.msk [vmem:[%s1518_s5 + $0x68] sm:$0xff] %vm754_vm2, %v661_v45 }
 0x1d5   :  { %767 = vst.msk [vmem:[%s1518_s5 + $0x60] sm:$0xff] %vm754_vm2, %v656_v47  ;;  %v1028_v48 = vpop.f32.mrb[12].mxu1 }
 0x1d6   :  { %v671_v49 = vadd.f32 %v1028_v48, %v1351_v20  ;;  %v665_v51 = vpop.f32.mrb[13].mxu1 }
 0x1d7   :  { %v666_v52 = vadd.f32 %v1351_v20, %v665_v51 }
 0x1d8   :  { %770 = vst.msk [vmem:[%s1518_s5 + $0x78] sm:$0xff] %vm754_vm2, %v671_v49 }
 0x1d9   :  { %769 = vst.msk [vmem:[%s1518_s5 + $0x70] sm:$0xff] %vm754_vm2, %v666_v52  ;;  %v1031_v53 = vpop.f32.mrb[14].mxu1 }
 0x1da   :  { %v681_v54 = vadd.f32 %v1031_v53, %v1351_v20  ;;  %v675_v55 = vpop.f32.mrb[15].mxu1 }
 0x1db   :  { %v676_v56 = vadd.f32 %v1351_v20, %v675_v55 }
 0x1dc   :  { %772 = vst.msk [vmem:[%s1518_s5 + $0x88] sm:$0xff] %vm754_vm2, %v681_v54 }
 0x1dd   :  { %771 = vst.msk [vmem:[%s1518_s5 + $0x80] sm:$0xff] %vm754_vm2, %v676_v56  ;;  %v1034_v57 = vpop.f32.mrb[16].mxu1 }
 0x1de   :  { %v691_v58 = vadd.f32 %v1034_v57, %v1351_v20  ;;  %v685_v59 = vpop.f32.mrb[17].mxu1 }
 0x1df   :  { %v686_v60 = vadd.f32 %v1351_v20, %v685_v59 }
 0x1e0   :  { %774 = vst.msk [vmem:[%s1518_s5 + $0x98] sm:$0xff] %vm754_vm2, %v691_v58 }
 0x1e1   :  { %773 = vst.msk [vmem:[%s1518_s5 + $0x90] sm:$0xff] %vm754_vm2, %v686_v60  ;;  %v1037_v61 = vpop.f32.mrb[18].mxu1 }
 0x1e2   :  { %v701_v62 = vadd.f32 %v1037_v61, %v1351_v20  ;;  %v695_v63 = vpop.f32.mrb[19].mxu1 }
 0x1e3   :  { %v696_v0 = vadd.f32 %v1351_v20, %v695_v63 }
 0x1e4   :  { %776 = vst.msk [vmem:[%s1518_s5 + $0xa8] sm:$0xff] %vm754_vm2, %v701_v62 }
 0x1e5   :  { %775 = vst.msk [vmem:[%s1518_s5 + $0xa0] sm:$0xff] %vm754_vm2, %v696_v0  ;;  %v1040_v1 = vpop.f32.mrb[20].mxu1 }
 0x1e6   :  { %v711_v2 = vadd.f32 %v1040_v1, %v1351_v20  ;;  %v705_v3 = vpop.f32.mrb[21].mxu1 }
 0x1e7   :  { %v706_v4 = vadd.f32 %v1351_v20, %v705_v3 }
 0x1e8   :  { %778 = vst.msk [vmem:[%s1518_s5 + $0xb8] sm:$0xff] %vm754_vm2, %v711_v2 }
 0x1e9   :  { %777 = vst.msk [vmem:[%s1518_s5 + $0xb0] sm:$0xff] %vm754_vm2, %v706_v4  ;;  %v1043_v5 = vpop.f32.mrb[22].mxu1 }
 0x1ea   :  { %v721_v6 = vadd.f32 %v1043_v5, %v1351_v20  ;;  %v715_v7 = vpop.f32.mrb[23].mxu1 }
 0x1eb   :  { %v716_v8 = vadd.f32 %v1351_v20, %v715_v7 }
 0x1ec   :  { %780 = vst.msk [vmem:[%s1518_s5 + $0xc8] sm:$0xff] %vm754_vm2, %v721_v6 }
 0x1ed   :  { %779 = vst.msk [vmem:[%s1518_s5 + $0xc0] sm:$0xff] %vm754_vm2, %v716_v8  ;;  %v1046_v9 = vpop.f32.mrb[24].mxu1 }
 0x1ee   :  { %v731_v10 = vadd.f32 %v1046_v9, %v1351_v20  ;;  %v725_v11 = vpop.f32.mrb[25].mxu1 }
 0x1ef   :  { %v726_v12 = vadd.f32 %v1351_v20, %v725_v11 }
 0x1f0   :  { %782 = vst.msk [vmem:[%s1518_s5 + $0xd8] sm:$0xff] %vm754_vm2, %v731_v10 }
 0x1f1   :  { %781 = vst.msk [vmem:[%s1518_s5 + $0xd0] sm:$0xff] %vm754_vm2, %v726_v12  ;;  %v1049_v13 = vpop.f32.mrb[26].mxu1 }
 0x1f2   :  { %v741_v14 = vadd.f32 %v1049_v13, %v1351_v20  ;;  %v735_v15 = vpop.f32.mrb[27].mxu1 }
 0x1f3   :  { %v736_v16 = vadd.f32 %v1351_v20, %v735_v15 }
 0x1f4   :  { %784 = vst.msk [vmem:[%s1518_s5 + $0xe8] sm:$0xff] %vm754_vm2, %v741_v14 }
 0x1f5   :  { %783 = vst.msk [vmem:[%s1518_s5 + $0xe0] sm:$0xff] %vm754_vm2, %v736_v16  ;;  %v1052_v17 = vpop.f32.mrb[28].mxu1 }
 0x1f6   :  { %v751_v18 = vadd.f32 %v1052_v17, %v1351_v20  ;;  %v745_v19 = vpop.f32.mrb[29].mxu1 }
 0x1f7   :  { %v746_v21 = vadd.f32 %v1351_v20, %v745_v19 }
 0x1f8   :  { %786 = vst.msk [vmem:[%s1518_s5 + $0xf8] sm:$0xff] %vm754_vm2, %v751_v18 }
 0x1f9   :  { %785 = vst.msk [vmem:[%s1518_s5 + $0xf0] sm:$0xff] %vm754_vm2, %v746_v21 }

</bundles_post_ra>
